<compile_context>
chip_gen: v5e
topology: v5e:2x2
jax: 0.10.0
libtpu: 0.0.40
codegen_flags: <defaults>
</compile_context>

<pallas_src>
import jax
import jax.numpy as jnp
from jax.experimental import pallas as pl
from jax.experimental.pallas import tpu as pltpu

INPUT_DIM = 28 * 28      # 784
NUM_HIDDEN = 32
OUTPUT_DIM = 10

HIDDEN_PAD = 128         # pad hidden to one full 128-lane group
TILE_B_MAX = 1024        # bf16 x-block = 1.6 MiB, double-buffered well under the
                         # 16 MiB (v5e) / 32 MiB (v6e/v7x) default scoped VMEM


def _round_up(x, m):
    return (x + m - 1) // m * m


def mlp_kernel(x_ref, w1_ref, b1_ref, w2_ref, b2_ref, o_ref):
    # (TILE_B, 784) bf16 @ (784, 128) bf16 -> f32 accumulate on the MXU
    h = jnp.dot(x_ref[...], w1_ref[...], preferred_element_type=jnp.float32)
    h = jnp.maximum(h + b1_ref[...], 0.0)               # bias + ReLU in f32 (VPU)
    # (TILE_B, 128) f32 @ (128, 10) f32 -> f32
    y = jnp.dot(h, w2_ref[...], preferred_element_type=jnp.float32)
    o_ref[...] = (y + b2_ref[...]).astype(o_ref.dtype)


def digit_nn_forward(x_nchw, w1, b1, w2, b2, *, use_bf16=True):
    """x_nchw: (B, 1, 28, 28) float32 -> logits (B, 10) float32.

    PyTorch semantics: per-sample ravel, then relu(x @ W1 + b1) @ W2 + b2.
    Weights stored (in, out); biases (1, out).
    """
    B = x_nchw.shape[0]

    # RavelTransform: per-sample flatten (DataLoader then stacks to (B, 784)).
    x_flat = x_nchw.reshape(B, INPUT_DIM)

    # Zero-pad the hidden dim to a full lane group: zero W1 columns give
    # relu(0 + 0) = 0 which multiplies zero W2 rows -> output unchanged.
    w1p = jnp.pad(w1, ((0, 0), (0, HIDDEN_PAD - NUM_HIDDEN)))
    b1p = jnp.pad(b1, ((0, 0), (0, HIDDEN_PAD - NUM_HIDDEN)))
    w2p = jnp.pad(w2, ((0, HIDDEN_PAD - NUM_HIDDEN), (0, 0)))

    if use_bf16:
        # Kernel is HBM-bound on the x stream; bf16 halves that traffic.
        x_flat = x_flat.astype(jnp.bfloat16)
        w1p = w1p.astype(jnp.bfloat16)

    # Batch tiling: biggest tile up to TILE_B_MAX, batch padded to whole tiles.
    tile_b = min(TILE_B_MAX, _round_up(B, 8))
    b_pad = _round_up(B, tile_b)
    if b_pad != B:
        x_flat = jnp.pad(x_flat, ((0, b_pad - B), (0, 0)))
    grid = (pl.cdiv(b_pad, tile_b),)

    itemsize = x_flat.dtype.itemsize
    cost = pl.CostEstimate(
        flops=2 * b_pad * (INPUT_DIM * HIDDEN_PAD + HIDDEN_PAD * OUTPUT_DIM),
        transcendentals=0,
        bytes_accessed=(b_pad * INPUT_DIM * itemsize            # x stream
                        + INPUT_DIM * HIDDEN_PAD * itemsize     # W1
                        + HIDDEN_PAD * (OUTPUT_DIM + 1) * 4     # W2 + b1
                        + b_pad * OUTPUT_DIM * 4),              # logits
    )

    out = pl.pallas_call(
        mlp_kernel,
        out_shape=jax.ShapeDtypeStruct((b_pad, OUTPUT_DIM), jnp.float32),
        grid=grid,
        in_specs=[
            pl.BlockSpec((tile_b, INPUT_DIM), lambda i: (i, 0)),       # streamed
            pl.BlockSpec((INPUT_DIM, HIDDEN_PAD), lambda i: (0, 0)),   # VMEM-resident
            pl.BlockSpec((1, HIDDEN_PAD), lambda i: (0, 0)),           # VMEM-resident
            pl.BlockSpec((HIDDEN_PAD, OUTPUT_DIM), lambda i: (0, 0)),  # VMEM-resident
            pl.BlockSpec((1, OUTPUT_DIM), lambda i: (0, 0)),           # VMEM-resident
        ],
        out_specs=pl.BlockSpec((tile_b, OUTPUT_DIM), lambda i: (i, 0)),
        compiler_params=pltpu.CompilerParams(
            dimension_semantics=("parallel",)),   # batch tiles are independent
        cost_estimate=cost,
    )(x_flat, w1p, b1p, w2p, b2)

    return out[:B]


def init_params(key):
    """Deterministic init mimicking PyTorch nn.Linear default (U[-1/sqrt(fan_in), +])."""
    k1, k2, k3, k4 = jax.random.split(key, 4)
    lim1 = 1.0 / jnp.sqrt(jnp.float32(INPUT_DIM))
    lim2 = 1.0 / jnp.sqrt(jnp.float32(NUM_HIDDEN))
    w1 = jax.random.uniform(k1, (INPUT_DIM, NUM_HIDDEN), jnp.float32, -lim1, lim1)
    b1 = jax.random.uniform(k2, (1, NUM_HIDDEN), jnp.float32, -lim1, lim1)
    w2 = jax.random.uniform(k3, (NUM_HIDDEN, OUTPUT_DIM), jnp.float32, -lim2, lim2)
    b2 = jax.random.uniform(k4, (1, OUTPUT_DIM), jnp.float32, -lim2, lim2)
    return w1, b1, w2, b2


if __name__ == "__main__":
    key = jax.random.PRNGKey(0)
    kx, kp = jax.random.split(key)

    B = 32  # matches the DataLoader batch_size=32 in the reference script
    # grayscale image batch, NCHW, values in [0, 1) like ToDtype(float32, scale=True)
    x = jax.random.uniform(kx, (B, 1, 28, 28), jnp.float32)
    w1, b1, w2, b2 = init_params(kp)

    out = digit_nn_forward(x, w1, b1, w2, b2)
    out = jax.block_until_ready(out)
    assert out.shape == (B, OUTPUT_DIM)

    # tight check against a reference that applies the same bf16 input rounding
    xr = x.reshape(B, INPUT_DIM).astype(jnp.bfloat16).astype(jnp.float32)
    w1r = w1.astype(jnp.bfloat16).astype(jnp.float32)
    h_ref = jnp.maximum(jnp.dot(xr, w1r, precision="highest") + b1, 0.0)
    ref = jnp.dot(h_ref, w2, precision="highest") + b2
    assert jnp.allclose(out, ref, atol=1e-3, rtol=1e-3)

    # loose sanity check vs. the pure-f32 PyTorch-equivalent forward
    ref_f32 = jnp.maximum(x.reshape(B, -1) @ w1 + b1, 0.0) @ w2 + b2
    assert jnp.allclose(out, ref_f32, atol=1e-1, rtol=1e-1)

    print("KERNEL_OK")
</pallas_src>

<mosaic_0001>
module attributes {stable_mosaic.version = 11 : i64} {
  func.func @mlp_kernel(%arg0: i32, %arg1: memref<32x784xbf16, #tpu.memory_space<vmem>>, %arg2: memref<784x128xbf16, #tpu.memory_space<vmem>>, %arg3: memref<1x128xf32, #tpu.memory_space<vmem>>, %arg4: memref<128x10xf32, #tpu.memory_space<vmem>>, %arg5: memref<1x10xf32, #tpu.memory_space<vmem>>, %arg6: memref<32x10xf32, #tpu.memory_space<vmem>>) attributes {dimension_semantics = [#tpu.dimension_semantics<parallel>], iteration_bounds = array<i64: 1>, scalar_prefetch = 0 : i64, scratch_operands = 0 : i64, tpu.core_type = #tpu.core_type<tc>, window_params = [{transform_indices = @transform_0, window_bounds = array<i64: 32, 784>}, {pipeline_mode = #tpu.pipeline_mode<synchronous>, transform_indices = @transform_1, window_bounds = array<i64: 784, 128>}, {pipeline_mode = #tpu.pipeline_mode<synchronous>, transform_indices = @transform_2, window_bounds = array<i64: 1, 128>}, {pipeline_mode = #tpu.pipeline_mode<synchronous>, transform_indices = @transform_3, window_bounds = array<i64: 128, 10>}, {pipeline_mode = #tpu.pipeline_mode<synchronous>, transform_indices = @transform_4, window_bounds = array<i64: 1, 10>}, {transform_indices = @transform_5, window_bounds = array<i64: 32, 10>}]} {
    %c0 = arith.constant 0 : index
    %c0_0 = arith.constant 0 : index
    %0 = vector.load %arg1[%c0, %c0_0] : memref<32x784xbf16, #tpu.memory_space<vmem>>, vector<32x784xbf16>
    %c0_1 = arith.constant 0 : index
    %c0_2 = arith.constant 0 : index
    %1 = vector.load %arg2[%c0_1, %c0_2] : memref<784x128xbf16, #tpu.memory_space<vmem>>, vector<784x128xbf16>
    %cst = arith.constant dense<0.000000e+00> : vector<32x128xf32>
    %2 = tpu.matmul %0, %1, %cst {dimension_numbers = #tpu.dot_dimension_numbers<[1], [0], [0], [1], [0, 0, 1, 1], [], []>} : vector<32x784xbf16>, vector<784x128xbf16>, vector<32x128xf32> -> vector<32x128xf32>
    %c0_3 = arith.constant 0 : index
    %c0_4 = arith.constant 0 : index
    %3 = vector.load %arg3[%c0_3, %c0_4] : memref<1x128xf32, #tpu.memory_space<vmem>>, vector<1x128xf32>
    %4 = vector.broadcast %3 : vector<1x128xf32> to vector<32x128xf32>
    %5 = arith.addf %2, %4 : vector<32x128xf32>
    %cst_5 = arith.constant 0.000000e+00 : f32
    %6 = vector.broadcast %cst_5 : f32 to vector<32x128xf32>
    %7 = arith.maximumf %5, %6 : vector<32x128xf32>
    %c0_6 = arith.constant 0 : index
    %c0_7 = arith.constant 0 : index
    %8 = vector.load %arg4[%c0_6, %c0_7] : memref<128x10xf32, #tpu.memory_space<vmem>>, vector<128x10xf32>
    %cst_8 = arith.constant dense<0.000000e+00> : vector<32x10xf32>
    %9 = tpu.matmul %7, %8, %cst_8 {dimension_numbers = #tpu.dot_dimension_numbers<[1], [0], [0], [1], [0, 0, 1, 1], [], []>} : vector<32x128xf32>, vector<128x10xf32>, vector<32x10xf32> -> vector<32x10xf32>
    %c0_9 = arith.constant 0 : index
    %c0_10 = arith.constant 0 : index
    %10 = vector.load %arg5[%c0_9, %c0_10] : memref<1x10xf32, #tpu.memory_space<vmem>>, vector<1x10xf32>
    %11 = vector.broadcast %10 : vector<1x10xf32> to vector<32x10xf32>
    %12 = arith.addf %9, %11 : vector<32x10xf32>
    %c0_11 = arith.constant 0 : index
    %c0_12 = arith.constant 0 : index
    %13 = vector.load %arg6[%c0_11, %c0_12] : memref<32x10xf32, #tpu.memory_space<vmem>>, vector<32x10xf32>
    tpu.vector_store %arg6[%c0_11, %c0_12], %12 {strides = array<i32>} : memref<32x10xf32, #tpu.memory_space<vmem>>, vector<32x10xf32>,
    return
  }
  func.func @transform_0(%arg0: i32) -> (i32, i32) {
    %c0_i32 = arith.constant 0 : i32
    %c0_i32_0 = arith.constant 0 : i32
    return %arg0, %c0_i32 : i32, i32
  }
  func.func @transform_1(%arg0: i32) -> (i32, i32) {
    %c0_i32 = arith.constant 0 : i32
    %c0_i32_0 = arith.constant 0 : i32
    %c0_i32_1 = arith.constant 0 : i32
    return %c0_i32, %c0_i32_0 : i32, i32
  }
  func.func @transform_2(%arg0: i32) -> (i32, i32) {
    %c0_i32 = arith.constant 0 : i32
    %c0_i32_0 = arith.constant 0 : i32
    %c0_i32_1 = arith.constant 0 : i32
    return %c0_i32, %c0_i32_0 : i32, i32
  }
  func.func @transform_3(%arg0: i32) -> (i32, i32) {
    %c0_i32 = arith.constant 0 : i32
    %c0_i32_0 = arith.constant 0 : i32
    %c0_i32_1 = arith.constant 0 : i32
    return %c0_i32, %c0_i32_0 : i32, i32
  }
  func.func @transform_4(%arg0: i32) -> (i32, i32) {
    %c0_i32 = arith.constant 0 : i32
    %c0_i32_0 = arith.constant 0 : i32
    %c0_i32_1 = arith.constant 0 : i32
    return %c0_i32, %c0_i32_0 : i32, i32
  }
  func.func @transform_5(%arg0: i32) -> (i32, i32) {
    %c0_i32 = arith.constant 0 : i32
    %c0_i32_0 = arith.constant 0 : i32
    return %arg0, %c0_i32 : i32, i32
  }
}

</mosaic_0001>

<bundles_post_ra>
// kernel: tpu_custom_call.1
= control target key start
LH: loop header
LB: loop body
LE: loop exit
PB: predicated region body
PF: predicated region fallthrough
CT: control target
= control target key end

     0   :  { %10 = vsyncpa [#allocation3], 0  ;;  %s1070_s21 = smov [#allocation2]   ;;  %s1071_s23 = smov 64   ;;  %s1256_s0 = inlined_call_operand.vmem [shape: bf16[32,784], index: 0, kind: input, shape index: {}]   ;;  %s1257_s1 = inlined_call_operand.hbm [shape: bf16[784,128], index: 1, kind: input, shape index: {}]   ;;  %s1258_s2 = inlined_call_operand.vmem [shape: f32[1,128], index: 2, kind: input, shape index: {}]   ;;  %s1259_s3 = inlined_call_operand.vmem [shape: f32[128,10], index: 3, kind: input, shape index: {}]   ;;  %s1260_s4 = inlined_call_operand.vmem [shape: f32[1,10], index: 4, kind: input, shape index: {}]   ;;  %s1261_s5 = inlined_call_operand.vmem [shape: f32[32,10], index: 5, kind: output, shape index: {}]  }
   0x1   :  { %s17_s20 = sshll.u32 %s1257_s1, 4  ;;  %s19_s22 = sshll.u32 %s1070_s21, 4  ;;  %s18_s20 = int_to_ptr.hbm [resolvable:$true] %s17_s20  ;;  %s20_s22 = int_to_ptr.vmem [resolvable:$true] %s19_s22 }
   0x2   :  { %s1072_s24 = smov 4  }
   0x3   :  { %25 = dma.hbm_to_vmem [thread:$0]  %s18_s20, 6272, %s20_s22, [#allocation3], %s1071_s23, %s1071_s23, %s1072_s24  }
   0x4   :  { %1068 = dma.done.wait [#allocation3], 6272  }
   0x5   :  { %1069 = vsyncadd [#allocation3], 4294961024  ;;  %v997_v0 = vld [vmem:[#allocation2 + $0x38] sm:$0xff]  ;;  %v996_v4 = vld [vmem:[#allocation2 + $0x30] sm:$0xff]  ;;  %vm519_vm0 = vcmask 130048   ;;  %vm712_vm1 = vcmask 80896  }
   0x6   :  { %v1005_v1 = vld [vmem:[#allocation2 + $0x78] sm:$0xff]  ;;  %526 = vmatpush.bf16.msra.mxu0 %v997_v0  ;;  %v1004_v5 = vld [vmem:[#allocation2 + $0x70] sm:$0xff]  ;;  %v995_v8 = vld [vmem:[#allocation2 + $0x28] sm:$0xff] }
   0x7   :  { %v1013_v2 = vld [vmem:[#allocation2 + $0xb8] sm:$0xff]  ;;  %545 = vmatpush.bf16.msra.mxu1 %v1005_v1  ;;  %v1012_v6 = vld [vmem:[#allocation2 + $0xb0] sm:$0xff]  ;;  %v1003_v9 = vld [vmem:[#allocation2 + $0x68] sm:$0xff] }
   0x8   :  { %v1021_v3 = vld [vmem:[#allocation2 + $0xf8] sm:$0xff]  ;;  %564 = vmatpush.bf16.msra.mxu2 %v1013_v2  ;;  %v1020_v7 = vld [vmem:[#allocation2 + $0xf0] sm:$0xff]  ;;  %v1011_v10 = vld [vmem:[#allocation2 + $0xa8] sm:$0xff] }
   0x9   :  { %583 = vmatpush.bf16.msra.mxu3 %v1021_v3  ;;  %v1019_v11 = vld [vmem:[#allocation2 + $0xe8] sm:$0xff]  ;;  %v994_v12 = vld [vmem:[#allocation2 + $0x20] sm:$0xff]  ;;  %v993_v16 = vld [vmem:[#allocation2 + $0x18] sm:$0xff] }
   0xa   :  { %527 = vmatpush.bf16.msra.mxu0 %v996_v4  ;;  %v1002_v13 = vld [vmem:[#allocation2 + $0x60] sm:$0xff]  ;;  %v1001_v17 = vld [vmem:[#allocation2 + $0x58] sm:$0xff]  ;;  %v992_v20 = vld [vmem:[#allocation2 + $0x10] sm:$0xff] }
   0xb   :  { %546 = vmatpush.bf16.msra.mxu1 %v1004_v5  ;;  %v1010_v14 = vld [vmem:[#allocation2 + $0xa0] sm:$0xff]  ;;  %v1009_v18 = vld [vmem:[#allocation2 + $0x98] sm:$0xff]  ;;  %v1000_v21 = vld [vmem:[#allocation2 + $0x50] sm:$0xff] }
   0xc   :  { %565 = vmatpush.bf16.msra.mxu2 %v1012_v6  ;;  %v1018_v15 = vld [vmem:[#allocation2 + $0xe0] sm:$0xff]  ;;  %v1017_v19 = vld [vmem:[#allocation2 + $0xd8] sm:$0xff]  ;;  %v1008_v22 = vld [vmem:[#allocation2 + $0x90] sm:$0xff] }
   0xd   :  { %584 = vmatpush.bf16.msra.mxu3 %v1020_v7  ;;  %v1016_v23 = vld [vmem:[#allocation2 + $0xd0] sm:$0xff]  ;;  %v991_v24 = vld [vmem:[#allocation2 + $0x8] sm:$0xff]  ;;  %v990_v28 = vld [vmem:[#allocation2] sm:$0xff] }
   0xe   :  { %528 = vmatpush.bf16.msra.mxu0 %v995_v8  ;;  %v999_v25 = vld [vmem:[#allocation2 + $0x48] sm:$0xff]  ;;  %v998_v29 = vld [vmem:[#allocation2 + $0x40] sm:$0xff]  ;;  %v979_v33 = vld [vmem:[%s1256_s0 + $0x18] sm:$0xf0] }
   0xf   :  { %547 = vmatpush.bf16.msra.mxu1 %v1003_v9  ;;  %v1007_v26 = vld [vmem:[#allocation2 + $0x88] sm:$0xff]  ;;  %v1006_v30 = vld [vmem:[#allocation2 + $0x80] sm:$0xff]  ;;  %v1029_v39 = vld [vmem:[#allocation2 + $0x138] sm:$0xff] }
  0x10   :  { %566 = vmatpush.bf16.msra.mxu2 %v1011_v10  ;;  %v1015_v27 = vld [vmem:[#allocation2 + $0xc8] sm:$0xff]  ;;  %v1014_v31 = vld [vmem:[#allocation2 + $0xc0] sm:$0xff]  ;;  %v1037_v45 = vld [vmem:[#allocation2 + $0x178] sm:$0xff] }
  0x11   :  { %585 = vmatpush.bf16.msra.mxu3 %v1019_v11  ;;  %v724_v32 = vld [vmem:[%s1256_s0] sm:$0xf]  ;;  %v976_v34 = vld [vmem:[%s1256_s0 + $0x4] sm:$0xf]  ;;  %v732_v36 = vld [vmem:[%s1256_s0 + $0x8] sm:$0xf] }
  0x12   :  { %529 = vmatpush.bf16.msra.mxu0 %v994_v12  ;;  %v726_v35 = vld [vmem:[%s1256_s0 + $0x1c] sm:$0xf0]  ;;  %v980_v37 = vld [vmem:[%s1256_s0 + $0x20] sm:$0xf0]  ;;  %v977_v40 = vld [vmem:[%s1256_s0 + $0xc] sm:$0xf]  ;;  %v725_v42 = vor.u32 %v979_v33, %v724_v32 }
  0x13   :  { %548 = vmatpush.bf16.msra.mxu1 %v1002_v13  ;;  %v1038_v38 = vld [vmem:[#allocation2 + $0x180] sm:$0xff]  ;;  %v734_v41 = vld [vmem:[%s1256_s0 + $0x24] sm:$0xf0]  ;;  %v729_v43 = vor.u32 %v976_v34, %v726_v35  ;;  %v733_v44 = vor.u32 %v980_v37, %v732_v36  ;;  %v1028_v47 = vld [vmem:[#allocation2 + $0x130] sm:$0xff] }
  0x14   :  { %567 = vmatpush.bf16.msra.mxu2 %v1010_v14  ;;  %v737_v46 = vor.u32 %v977_v40, %v734_v41  ;;  %v1036_v48 = vld [vmem:[#allocation2 + $0x170] sm:$0xff]  ;;  %v1027_v49 = vld [vmem:[#allocation2 + $0x128] sm:$0xff]  ;;  %v1026_v51 = vld [vmem:[#allocation2 + $0x120] sm:$0xff] }
  0x15   :  { %586 = vmatpush.bf16.msra.mxu3 %v1018_v15  ;;  %v1035_v50 = vld [vmem:[#allocation2 + $0x168] sm:$0xff]  ;;  %v1034_v52 = vld [vmem:[#allocation2 + $0x160] sm:$0xff]  ;;  %v752_v53 = vld [vmem:[%s1256_s0 + $0x38] sm:$0xf] }
  0x16   :  { %530 = vmatpush.bf16.msra.mxu0 %v993_v16  ;;  %v986_v54 = vld [vmem:[%s1256_s0 + $0x50] sm:$0xf0]  ;;  %v983_v55 = vld [vmem:[%s1256_s0 + $0x3c] sm:$0xf]  ;;  %v754_v56 = vld [vmem:[%s1256_s0 + $0x54] sm:$0xf0] }
  0x17   :  { %549 = vmatpush.bf16.msra.mxu1 %v1001_v17  ;;  %v760_v57 = vld [vmem:[%s1256_s0 + $0x40] sm:$0xf]  ;;  %v987_v58 = vld [vmem:[%s1256_s0 + $0x58] sm:$0xf0]  ;;  %v984_v60 = vld [vmem:[%s1256_s0 + $0x44] sm:$0xf]  ;;  %v753_v62 = vor.u32 %v986_v54, %v752_v53  ;;  %v757_v63 = vor.u32 %v983_v55, %v754_v56 }
  0x18   :  { %568 = vmatpush.bf16.msra.mxu2 %v1009_v18  ;;  %v1025_v59 = vld [vmem:[#allocation2 + $0x118] sm:$0xff]  ;;  %v762_v61 = vld [vmem:[%s1256_s0 + $0x5c] sm:$0xf0]  ;;  %v761_v0 = vor.u32 %v987_v58, %v760_v57  ;;  %v1024_v3 = vld [vmem:[#allocation2 + $0x110] sm:$0xff] }
  0x19   :  { %587 = vmatpush.bf16.msra.mxu3 %v1017_v19  ;;  %v1033_v1 = vld [vmem:[#allocation2 + $0x158] sm:$0xff]  ;;  %v765_v2 = vor.u32 %v984_v60, %v762_v61  ;;  %v1032_v4 = vld [vmem:[#allocation2 + $0x150] sm:$0xff]  ;;  %v1023_v5 = vld [vmem:[#allocation2 + $0x108] sm:$0xff] }
  0x1a   :  { %531 = vmatpush.bf16.msra.mxu0 %v992_v20  ;;  %v1031_v6 = vld [vmem:[#allocation2 + $0x148] sm:$0xff]  ;;  %v1022_v7 = vld [vmem:[#allocation2 + $0x100] sm:$0xff]  ;;  %v740_v9 = vld [vmem:[%s1256_s0 + $0x10] sm:$0xf] }
  0x1b   :  { %550 = vmatpush.bf16.msra.mxu1 %v1000_v21  ;;  %v1030_v8 = vld [vmem:[#allocation2 + $0x140] sm:$0xff]  ;;  %v981_v10 = vld [vmem:[%s1256_s0 + $0x28] sm:$0xf0]  ;;  %v978_v11 = vld [vmem:[%s1256_s0 + $0x14] sm:$0xf] }
  0x1c   :  { %569 = vmatpush.bf16.msra.mxu2 %v1008_v22  ;;  %v742_v12 = vld [vmem:[%s1256_s0 + $0x2c] sm:$0xf0]  ;;  %v748_v13 = vld [vmem:[%s1256_s0 + $0x18] sm:$0xf]  ;;  %v982_v14 = vld [vmem:[%s1256_s0 + $0x30] sm:$0xf0]  ;;  %v741_v15 = vor.u32 %v981_v10, %v740_v9 }
  0x1d   :  { %588 = vmatpush.bf16.msra.mxu3 %v1016_v23  ;;  %v745_v16 = vor.u32 %v978_v11, %v742_v12  ;;  %v749_v17 = vor.u32 %v982_v14, %v748_v13  ;;  %v768_v18 = vld [vmem:[%s1256_s0 + $0x48] sm:$0xf]  ;;  %v988_v19 = vld [vmem:[%s1256_s0 + $0x60] sm:$0xf0]  ;;  %v985_v20 = vld [vmem:[%s1256_s0 + $0x4c] sm:$0xf] }
  0x1e   :  { %532 = vmatpush.bf16.msra.mxu0 %v991_v24  ;;  %v770_v21 = vld [vmem:[%s1256_s0 + $0x64] sm:$0xf0]  ;;  %v776_v22 = vld [vmem:[%s1256_s0 + $0x50] sm:$0xf]  ;;  %v989_v23 = vld [vmem:[%s1256_s0 + $0x68] sm:$0xf0]  ;;  %v769_v24 = vor.u32 %v988_v19, %v768_v18 }
  0x1f   :  { %551 = vmatpush.bf16.msra.mxu1 %v999_v25  ;;  %v773_v25 = vor.u32 %v985_v20, %v770_v21  ;;  %v673_v32 = vld [vmem:[%s1259_s3 + $0x50] sm:$0xff]  ;;  %v672_v33 = vld [vmem:[%s1259_s3 + $0x48] sm:$0xff]  ;;  %v671_v34 = vld [vmem:[%s1259_s3 + $0x40] sm:$0xff] }
  0x20   :  { %570 = vmatpush.bf16.msra.mxu2 %v1007_v26  ;;  %v777_v26 = vor.u32 %v989_v23, %v776_v22  ;;  %v670_v35 = vld [vmem:[%s1259_s3 + $0x38] sm:$0xff]  ;;  %v669_v36 = vld [vmem:[%s1259_s3 + $0x30] sm:$0xff]  ;;  %v667_v40 = vld [vmem:[%s1259_s3 + $0x20] sm:$0xff] }
  0x21   :  { %589 = vmatpush.bf16.msra.mxu3 %v1015_v27  ;;  %v678_v27 = vld [vmem:[%s1259_s3 + $0x78] sm:$0xff] }
  0x22   :  { %533 = vmatpush.bf16.msra.mxu0 %v990_v28  ;;  %v677_v28 = vld [vmem:[%s1259_s3 + $0x70] sm:$0xff]  ;;  %v666_v41 = vld [vmem:[%s1259_s3 + $0x18] sm:$0xff] }
  0x23   :  { %552 = vmatpush.bf16.msra.mxu1 %v998_v29  ;;  %v676_v29 = vld [vmem:[%s1259_s3 + $0x68] sm:$0xff] }
  0x24   :  { %571 = vmatpush.bf16.msra.mxu2 %v1006_v30  ;;  %v675_v30 = vld [vmem:[%s1259_s3 + $0x60] sm:$0xff] }
  0x25   :  { %590 = vmatpush.bf16.msra.mxu3 %v1014_v31  ;;  %534 = vmatmul.bf16.vlgmr.msra.gmra.mxu0 %v725_v42  ;;  %v674_v31 = vld [vmem:[%s1259_s3 + $0x58] sm:$0xff]  ;;  %v665_v42 = vld [vmem:[%s1259_s3 + $0x10] sm:$0xff] }
  0x26   :  { %602 = vmatpush.bf16.msrb.mxu0 %v1029_v39  ;;  %553 = vmatmul.bf16.vlgmr.msra.gmra.mxu1 %v729_v43  ;;  %v668_v39 = vld [vmem:[%s1259_s3 + $0x28] sm:$0xff] }
  0x27   :  { %572 = vmatmul.bf16.vlgmr.msra.gmra.mxu2 %v733_v44  ;;  %621 = vmatpush.bf16.msrb.mxu1 %v1037_v45 }
  0x28   :  { %647 = vmatpush.bf16.msrb.mxu2 %v1038_v38  ;;  %591 = vmatmul.bf16.vlgmr.msra.gmra.mxu3 %v737_v46  ;;  %v664_v46 = vld [vmem:[%s1259_s3 + $0x8] sm:$0xff] }
  0x29   :  { %683 = vmatpush.msrb.mxu3 %v678_v27 }
  0x2a   :  { %603 = vmatpush.bf16.msrb.mxu0 %v1028_v47  ;;  %v663_v47 = vld [vmem:[%s1259_s3] sm:$0xff] }
  0x2b   :  { %622 = vmatpush.bf16.msrb.mxu1 %v1036_v48  ;;  %684 = vmatpush.msrb.mxu3 %v677_v28 }
  0x2d   :  { %685 = vmatpush.msrb.mxu3 %v676_v29 }
  0x2e   :  { %604 = vmatpush.bf16.msrb.mxu0 %v1027_v49  ;;  %v1042_v49 = vld [vmem:[%s1258_s2] ss:$0 sm:$0xff] }
  0x2f   :  { %623 = vmatpush.bf16.msrb.mxu1 %v1035_v50  ;;  %686 = vmatpush.msrb.mxu3 %v675_v30 }
  0x31   :  { %687 = vmatpush.msrb.mxu3 %v674_v31 }
  0x32   :  { %605 = vmatpush.bf16.msrb.mxu0 %v1026_v51 }
  0x33   :  { %624 = vmatpush.bf16.msrb.mxu1 %v1034_v52  ;;  %688 = vmatpush.msrb.mxu3 %v673_v32 }
  0x35   :  { %539 = vmatmul.bf16.gmra.mxu0 %v753_v62  ;;  %689 = vmatpush.msrb.mxu3 %v672_v33 }
  0x36   :  { %606 = vmatpush.bf16.msrb.mxu0 %v1025_v59  ;;  %558 = vmatmul.bf16.gmra.mxu1 %v757_v63 }
  0x37   :  { %577 = vmatmul.bf16.gmra.mxu2 %v761_v0  ;;  %625 = vmatpush.bf16.msrb.mxu1 %v1033_v1 }
  0x38   :  { %596 = vmatmul.bf16.gmra.mxu3 %v765_v2 }
  0x39   :  { %690 = vmatpush.msrb.mxu3 %v671_v34 }
  0x3a   :  { %607 = vmatpush.bf16.msrb.mxu0 %v1024_v3 }
  0x3b   :  { %626 = vmatpush.bf16.msrb.mxu1 %v1032_v4  ;;  %691 = vmatpush.msrb.mxu3 %v670_v35 }
  0x3d   :  { %692 = vmatpush.msrb.mxu3 %v669_v36 }
  0x3e   :  { %608 = vmatpush.bf16.msrb.mxu0 %v1023_v5 }
  0x3f   :  { %627 = vmatpush.bf16.msrb.mxu1 %v1031_v6  ;;  %693 = vmatpush.msrb.mxu3 %v668_v39 }
  0x41   :  { %694 = vmatpush.msrb.mxu3 %v667_v40  ;;  %v1043_v40 = vld [vmem:[%s1260_s4] ss:$0 sm:$0xff] }
  0x42   :  { %609 = vmatpush.bf16.msrb.mxu0 %v1022_v7 }
  0x43   :  { %628 = vmatpush.bf16.msrb.mxu1 %v1030_v8  ;;  %695 = vmatpush.msrb.mxu3 %v666_v41 }
  0x45   :  { %610 = vmatmul.bf16.vlgmr.msrb.gmra.mxu0 %v741_v15  ;;  %696 = vmatpush.msrb.mxu3 %v665_v42 }
  0x46   :  { %629 = vmatmul.bf16.vlgmr.msrb.gmra.mxu1 %v745_v16 }
  0x47   :  { %974 = vmatmul.msk.bf16.vlgmr.msrb.gmra.mxu2 %vm519_vm0, %v749_v17  ;;  %697 = vmatpush.msrb.mxu3 %v664_v46 }
  0x49   :  { %698 = vmatpush.msrb.mxu3 %v663_v47 }
  0x55   :  { %615 = vmatmul.bf16.gmra.mxu0 %v769_v24 }
  0x56   :  { %634 = vmatmul.bf16.gmra.mxu1 %v773_v25 }
  0x57   :  { %975 = vmatmul.msk.bf16.gmra.mxu2 %vm519_vm0, %v777_v26 }
  0xa2   :  { %v535_v37 = vpop.f32.mrf.mxu0 }
  0xa3   :  { %v554_v38 = vpop.f32.mrf.mxu1  ;;  %v536_v52 = vadd.f32 %v1042_v49, %v535_v37 }
  0xa5   :  { %v555_v55 = vadd.f32 %v554_v38, %v536_v52 }
  0xaa   :  { %v573_v43 = vpop.f32.mrf.mxu2  ;;  %v537_v44 = vpop.f32.mrf.mxu0 }
  0xab   :  { %v556_v45 = vpop.f32.mrf.mxu1  ;;  %v592_v53 = vpop.f32.mrf.mxu3  ;;  %v574_v58 = vadd.f32 %v573_v43, %v555_v55  ;;  %v538_v59 = vadd.f32 %v1042_v49, %v537_v44 }
  0xad   :  { %v593_v61 = vadd.f32 %v592_v53, %v574_v58  ;;  %v557_v1 = vadd.f32 %v556_v45, %v538_v59 }
  0xb2   :  { %v575_v48 = vpop.f32.mrf.mxu2  ;;  %v540_v50 = vpop.f32.mrf.mxu0 }
  0xb3   :  { %v559_v51 = vpop.f32.mrf.mxu1  ;;  %v594_v0 = vpop.f32.mrf.mxu3  ;;  %v576_v3 = vadd.f32 %v575_v48, %v557_v1  ;;  %v541_v4 = vadd.f32 %v1042_v49, %v540_v50 }
  0xb5   :  { %v560_v7 = vadd.f32 %v559_v51, %v541_v4  ;;  %v595_v8 = vadd.f32 %v594_v0, %v576_v3 }
  0xba   :  { %v578_v54 = vpop.f32.mrf.mxu2  ;;  %v542_v56 = vpop.f32.mrf.mxu0 }
  0xbb   :  { %v561_v57 = vpop.f32.mrf.mxu1  ;;  %v597_v14 = vpop.f32.mrf.mxu3  ;;  %v579_v15 = vadd.f32 %v578_v54, %v560_v7  ;;  %v543_v16 = vadd.f32 %v1042_v49, %v542_v56 }
  0xbd   :  { %v598_v19 = vadd.f32 %v597_v14, %v579_v15  ;;  %v562_v22 = vadd.f32 %v561_v57, %v543_v16 }
  0xc2   :  { %v580_v60 = vpop.f32.mrf.mxu2  ;;  %v611_v62 = vpop.f32.mrf.mxu0 }
  0xc3   :  { %v630_v63 = vpop.f32.mrf.mxu1  ;;  %v612_v2 = vadd.f32 %v611_v62, %v593_v61  ;;  %v581_v26 = vadd.f32 %v580_v60, %v562_v22  ;;  %v599_v27 = vpop.f32.mrf.mxu3 }
  0xc5   :  { %v631_v5 = vadd.f32 %v630_v63, %v612_v2  ;;  %v600_v30 = vadd.f32 %v599_v27, %v581_v26 }
  0xca   :  { %v649_v6 = vpop.f32.mrf.mxu2  ;;  %v613_v10 = vpop.f32.mrf.mxu0 }
  0xcb   :  { %v650_v9 = vadd.f32 %v649_v6, %v631_v5  ;;  %v632_v11 = vpop.f32.mrf.mxu1  ;;  %v614_v13 = vadd.f32 %v613_v10, %v595_v8 }
  0xcd   :  { %v659_v12 = vmax.f32 %v650_v9, 0.0  ;;  %v633_v17 = vadd.f32 %v632_v11, %v614_v13 }
  0xcf   :  { %699 = vmatmul.f32.vlgmr.msrb.gmra.mxu3 %v659_v12 }
  0xd2   :  { %v651_v18 = vpop.f32.mrf.mxu2  ;;  %v616_v21 = vpop.f32.mrf.mxu0 }
  0xd3   :  { %v652_v20 = vadd.f32 %v651_v18, %v633_v17  ;;  %v617_v24 = vadd.f32 %v616_v21, %v598_v19  ;;  %v635_v25 = vpop.f32.mrf.mxu1 }
  0xd5   :  { %v660_v23 = vmax.f32 %v652_v20, 0.0  ;;  %v636_v28 = vadd.f32 %v635_v25, %v617_v24 }
  0xd7   :  { %702 = vmatmul.f32.gmra.mxu3 %v660_v23 }
  0xda   :  { %v654_v29 = vpop.f32.mrf.mxu2  ;;  %v618_v32 = vpop.f32.mrf.mxu0 }
  0xdb   :  { %v655_v31 = vadd.f32 %v654_v29, %v636_v28  ;;  %v619_v34 = vadd.f32 %v618_v32, %v600_v30  ;;  %v637_v35 = vpop.f32.mrf.mxu1 }
  0xdd   :  { %v661_v33 = vmax.f32 %v655_v31, 0.0  ;;  %v638_v36 = vadd.f32 %v637_v35, %v619_v34 }
  0xdf   :  { %705 = vmatmul.f32.gmra.mxu3 %v661_v33 }
  0xe2   :  { %v656_v37 = vpop.f32.mrf.mxu2 }
  0xe3   :  { %v657_v38 = vadd.f32 %v656_v37, %v638_v36 }
  0xe5   :  { %v662_v39 = vmax.f32 %v657_v38, 0.0 }
  0xe7   :  { %708 = vmatmul.f32.gmra.mxu3 %v662_v39 }
 0x152   :  { %v700_v41 = vpop.f32.mrf.mxu3 }
 0x153   :  { %v701_v42 = vadd.f32 %v1043_v40, %v700_v41 }
 0x155   :  { %713 = vst.msk [vmem:[%s1261_s5] sm:$0xff] %vm712_vm1, %v701_v42 }
 0x15a   :  { %v703_v43 = vpop.f32.mrf.mxu3 }
 0x15b   :  { %v704_v44 = vadd.f32 %v1043_v40, %v703_v43 }
 0x15d   :  { %714 = vst.msk [vmem:[%s1261_s5 + $0x8] sm:$0xff] %vm712_vm1, %v704_v44 }
 0x162   :  { %v706_v45 = vpop.f32.mrf.mxu3 }
 0x163   :  { %v707_v46 = vadd.f32 %v1043_v40, %v706_v45 }
 0x165   :  { %715 = vst.msk [vmem:[%s1261_s5 + $0x10] sm:$0xff] %vm712_vm1, %v707_v46 }
 0x16a   :  { %v709_v47 = vpop.f32.mrf.mxu3 }
 0x16b   :  { %v710_v48 = vadd.f32 %v1043_v40, %v709_v47 }
 0x16d   :  { %716 = vst.msk [vmem:[%s1261_s5 + $0x18] sm:$0xff] %vm712_vm1, %v710_v48 }
 0x16e   :  { %721 = vsyncpa [#allocation3], 1 }

</bundles_post_ra>
